<compile_context>
chip_gen: v7x
topology: tpu7x:2x2x1
jax: 0.10.0
libtpu: 0.0.40
codegen_flags: <defaults>
</compile_context>

<pallas_src>
import functools

import jax
import jax.numpy as jnp
import numpy as np
from jax.experimental import pallas as pl
from jax.experimental.pallas import tpu as pltpu


def _self_attn_kernel(x_ref, w_ref, b_ref, seg_ref, segt_ref, o_ref, *, n_heads):
    Bb, L, D = x_ref.shape
    x = x_ref[...]                        # (Bb, L, D)
    x0 = x[:, 0, :]                       # (Bb, D) -- only query token 0 is needed
    x2 = x.reshape(Bb * L, D)             # (Bb*L, D)

    # Weight slab rows: [scale*W_q ; W_k ; W_v ; W_o]  (sublane slices, cheap).
    wq = w_ref[0 * D:1 * D, :]
    wk = w_ref[1 * D:2 * D, :]
    wv = w_ref[2 * D:3 * D, :]
    wo = w_ref[3 * D:4 * D, :]
    bq = b_ref[0:1, :]
    bk = b_ref[1:2, :]
    bv = b_ref[2:3, :]
    bo = b_ref[3:4, :]

    # Q only for token 0 (scale already folded into wq/bq); separate K and V
    # matmuls (no lane slices of a fused kv).
    q0 = jnp.dot(x0, wq, preferred_element_type=jnp.float32) + bq           # (Bb, D)
    k = (jnp.dot(x2, wk, preferred_element_type=jnp.float32) + bk
         ).reshape(Bb, L, D)
    v = (jnp.dot(x2, wv, preferred_element_type=jnp.float32) + bv
         ).reshape(Bb, L, D)

    # Per-head scores for query token 0:
    #   s[b, l, h] = sum_{d in head h} q0[b, d] * k[b, l, d]
    qk = q0[:, None, :] * k                                                 # (Bb, L, D)
    s = jnp.dot(qk.reshape(Bb * L, D), seg_ref[...],
                preferred_element_type=jnp.float32).reshape(Bb, L, n_heads)

    # Softmax over the key axis (L), per (batch, head).
    m = jnp.max(s, axis=1, keepdims=True)
    p = jnp.exp(s - m)
    p = p / jnp.sum(p, axis=1, keepdims=True)   # exact divide to hold 1e-5 tol

    # Broadcast head weights back to the full D lanes and contract with V.
    p_full = jnp.dot(p.reshape(Bb * L, n_heads), segt_ref[...],
                     preferred_element_type=jnp.float32).reshape(Bb, L, D)
    attn = jnp.sum(p_full * v, axis=1)                                      # (Bb, D)

    o_ref[...] = jnp.dot(attn, wo, preferred_element_type=jnp.float32) + bo


def pack_params(params, n_heads):
    """One-time packing of raw (W_q^T,b_q,...,W_o^T,b_o) into kernel operands.

    Call this once at parameter-init time; the per-call path then contains
    only the pallas_call (nothing left to constant-fold per call).
    """
    wq, bq, wk, bk, wv, bv, wo, bo = params
    D = wq.shape[0]
    head_dim = D // n_heads
    scale = 1.0 / (head_dim ** 0.5)
    w_slab = jnp.concatenate([wq * scale, wk, wv, wo], axis=0)        # (4D, D)
    b_slab = jnp.stack([bq * scale, bk, bv, bo], axis=0)              # (4, D)
    seg = (jnp.arange(D)[:, None] // head_dim
           == jnp.arange(n_heads)[None, :]).astype(jnp.float32)       # (D, H)
    segt = seg.T                                                      # (H, D)
    return w_slab, b_slab, seg, segt


def self_attn_encoder(x, packed, *, block_b=None):
    """x: (B, L, D) f32, packed = pack_params(...).  Returns (B, D)."""
    w_slab, b_slab, seg, segt = packed
    B, L, D = x.shape
    n_heads = seg.shape[1]

    # Default: whole batch in one grid step. The grid is a serial loop on
    # single-TC chips and each step costs ~600 cycles of pipeline overhead,
    # which exceeds the entire compute at these shapes.
    if block_b is None:
        block_b = B
    assert B % block_b == 0, "block_b must divide B"
    grid_steps = B // block_b

    kernel = functools.partial(_self_attn_kernel, n_heads=n_heads)
    const2 = lambda b: (0, 0)

    out = pl.pallas_call(
        kernel,
        out_shape=jax.ShapeDtypeStruct((B, D), jnp.float32),
        grid_spec=pltpu.PrefetchScalarGridSpec(
            num_scalar_prefetch=0,
            grid=(grid_steps,),
            in_specs=[
                pl.BlockSpec((block_b, L, D), lambda b: (b, 0, 0)),   # x
                pl.BlockSpec((4 * D, D), const2),                     # weight slab
                pl.BlockSpec((4, D), const2),                         # bias slab
                pl.BlockSpec((D, n_heads), const2),                   # head mask
                pl.BlockSpec((n_heads, D), const2),                   # head mask^T
            ],
            out_specs=pl.BlockSpec((block_b, D), lambda b: (b, 0)),
        ),
        compiler_params=pltpu.CompilerParams(
            dimension_semantics=(("arbitrary",) if grid_steps == 1
                                 else ("parallel",))),
    )(x, w_slab, b_slab, seg, segt)
    return out


def _ref_forward(x, params, n_heads):
    """Pure-JAX reference mirroring the PyTorch forward (is_agent=True)."""
    wq, bq, wk, bk, wv, bv, wo, bo = params
    B, L, D = x.shape
    hd = D // n_heads
    q = (x @ wq + bq).reshape(B, L, n_heads, hd).transpose(0, 2, 1, 3)
    k = (x @ wk + bk).reshape(B, L, n_heads, hd).transpose(0, 2, 1, 3)
    v = (x @ wv + bv).reshape(B, L, n_heads, hd).transpose(0, 2, 1, 3)
    attn = jnp.einsum("bhqd,bhkd->bhqk", q, k) / (hd ** 0.5)
    attn = jax.nn.softmax(attn, axis=-1)
    o = jnp.einsum("bhqk,bhkd->bhqd", attn, v)
    o = o.transpose(0, 2, 1, 3).reshape(B, L, D)
    o = o @ wo + bo
    return o[:, 0]


def _make_params(key, D, scale=0.1):
    ks = jax.random.split(key, 8)
    return (
        scale * jax.random.normal(ks[0], (D, D), jnp.float32),  # W_q^T
        scale * jax.random.normal(ks[1], (D,), jnp.float32),    # b_q
        scale * jax.random.normal(ks[2], (D, D), jnp.float32),  # W_k^T
        scale * jax.random.normal(ks[3], (D,), jnp.float32),    # b_k
        scale * jax.random.normal(ks[4], (D, D), jnp.float32),  # W_v^T
        scale * jax.random.normal(ks[5], (D,), jnp.float32),    # b_v
        scale * jax.random.normal(ks[6], (D, D), jnp.float32),  # W_o^T
        scale * jax.random.normal(ks[7], (D,), jnp.float32),    # b_o
    )


if __name__ == "__main__":
    # is_agent=True -> x: (meta_batch=2, batch_size=8, context_dim=32), n_heads=4.
    B, L, D, H = 2, 8, 32, 4

    key = jax.random.PRNGKey(0)
    kx, kp, kx2 = jax.random.split(key, 3)
    x = jax.random.normal(kx, (B, L, D), dtype=jnp.float32)
    params = _make_params(kp, D)

    # One-time packing (done at param-init time in real use).
    packed = jax.block_until_ready(pack_params(params, H))

    # Default path: whole batch in a single grid step.
    out = jax.block_until_ready(self_attn_encoder(x, packed))
    ref = _ref_forward(x, params, H)
    np.testing.assert_allclose(np.asarray(out), np.asarray(ref), rtol=1e-5, atol=1e-5)

    # Also exercise the multi-grid-step path (block_b = 2 over B = 4) and the
    # larger single-step path.
    B2 = 4
    x2 = jax.random.normal(kx2, (B2, L, D), dtype=jnp.float32)
    ref2 = _ref_forward(x2, params, H)
    out2a = jax.block_until_ready(self_attn_encoder(x2, packed))              # grid=(1,)
    out2b = jax.block_until_ready(self_attn_encoder(x2, packed, block_b=2))   # grid=(2,)
    np.testing.assert_allclose(np.asarray(out2a), np.asarray(ref2), rtol=1e-5, atol=1e-5)
    np.testing.assert_allclose(np.asarray(out2b), np.asarray(ref2), rtol=1e-5, atol=1e-5)

    print("KERNEL_OK")
</pallas_src>

<mosaic_0001>
module attributes {stable_mosaic.version = 11 : i64} {
  func.func @_self_attn_kernel(%arg0: i32, %arg1: memref<2x8x32xf32, #tpu.memory_space<vmem>>, %arg2: memref<128x32xf32, #tpu.memory_space<vmem>>, %arg3: memref<4x32xf32, #tpu.memory_space<vmem>>, %arg4: memref<32x4xf32, #tpu.memory_space<vmem>>, %arg5: memref<4x32xf32, #tpu.memory_space<vmem>>, %arg6: memref<2x32xf32, #tpu.memory_space<vmem>>) attributes {dimension_semantics = [#tpu.dimension_semantics<arbitrary>], iteration_bounds = array<i64: 1>, scalar_prefetch = 0 : i64, scratch_operands = 0 : i64, tpu.core_type = #tpu.core_type<tc>, window_params = [{transform_indices = @transform_0, window_bounds = array<i64: 2, 8, 32>}, {pipeline_mode = #tpu.pipeline_mode<synchronous>, transform_indices = @transform_1, window_bounds = array<i64: 128, 32>}, {pipeline_mode = #tpu.pipeline_mode<synchronous>, transform_indices = @transform_2, window_bounds = array<i64: 4, 32>}, {pipeline_mode = #tpu.pipeline_mode<synchronous>, transform_indices = @transform_3, window_bounds = array<i64: 32, 4>}, {pipeline_mode = #tpu.pipeline_mode<synchronous>, transform_indices = @transform_4, window_bounds = array<i64: 4, 32>}, {transform_indices = @transform_5, window_bounds = array<i64: 2, 32>}]} {
    %c0 = arith.constant 0 : index
    %c0_0 = arith.constant 0 : index
    %c0_1 = arith.constant 0 : index
    %0 = vector.load %arg1[%c0, %c0_0, %c0_1] : memref<2x8x32xf32, #tpu.memory_space<vmem>>, vector<2x8x32xf32>
    %1 = vector.extract_strided_slice %0 {offsets = [0, 0, 0], sizes = [2, 1, 32], strides = [1, 1, 1]} : vector<2x8x32xf32> to vector<2x1x32xf32>
    %2 = vector.shape_cast %1 : vector<2x1x32xf32> to vector<2x32xf32>
    %3 = vector.shape_cast %0 : vector<2x8x32xf32> to vector<16x32xf32>
    %c0_2 = arith.constant 0 : index
    %c0_3 = arith.constant 0 : index
    %4 = vector.load %arg2[%c0_2, %c0_3] : memref<128x32xf32, #tpu.memory_space<vmem>>, vector<32x32xf32>
    %c32 = arith.constant 32 : index
    %c0_4 = arith.constant 0 : index
    %5 = vector.load %arg2[%c32, %c0_4] : memref<128x32xf32, #tpu.memory_space<vmem>>, vector<32x32xf32>
    %c64 = arith.constant 64 : index
    %c0_5 = arith.constant 0 : index
    %6 = vector.load %arg2[%c64, %c0_5] : memref<128x32xf32, #tpu.memory_space<vmem>>, vector<32x32xf32>
    %c96 = arith.constant 96 : index
    %c0_6 = arith.constant 0 : index
    %7 = vector.load %arg2[%c96, %c0_6] : memref<128x32xf32, #tpu.memory_space<vmem>>, vector<32x32xf32>
    %c0_7 = arith.constant 0 : index
    %c0_8 = arith.constant 0 : index
    %8 = vector.load %arg3[%c0_7, %c0_8] : memref<4x32xf32, #tpu.memory_space<vmem>>, vector<1x32xf32>
    %c1 = arith.constant 1 : index
    %c0_9 = arith.constant 0 : index
    %9 = vector.load %arg3[%c1, %c0_9] : memref<4x32xf32, #tpu.memory_space<vmem>>, vector<1x32xf32>
    %c2 = arith.constant 2 : index
    %c0_10 = arith.constant 0 : index
    %10 = vector.load %arg3[%c2, %c0_10] : memref<4x32xf32, #tpu.memory_space<vmem>>, vector<1x32xf32>
    %c3 = arith.constant 3 : index
    %c0_11 = arith.constant 0 : index
    %11 = vector.load %arg3[%c3, %c0_11] : memref<4x32xf32, #tpu.memory_space<vmem>>, vector<1x32xf32>
    %cst = arith.constant dense<0.000000e+00> : vector<2x32xf32>
    %12 = tpu.matmul %2, %4, %cst {dimension_numbers = #tpu.dot_dimension_numbers<[1], [0], [0], [1], [0, 0, 1, 1], [], []>} : vector<2x32xf32>, vector<32x32xf32>, vector<2x32xf32> -> vector<2x32xf32>
    %13 = vector.broadcast %8 : vector<1x32xf32> to vector<2x32xf32>
    %14 = arith.addf %12, %13 : vector<2x32xf32>
    %cst_12 = arith.constant dense<0.000000e+00> : vector<16x32xf32>
    %15 = tpu.matmul %3, %5, %cst_12 {dimension_numbers = #tpu.dot_dimension_numbers<[1], [0], [0], [1], [0, 0, 1, 1], [], []>} : vector<16x32xf32>, vector<32x32xf32>, vector<16x32xf32> -> vector<16x32xf32>
    %16 = vector.broadcast %9 : vector<1x32xf32> to vector<16x32xf32>
    %17 = arith.addf %15, %16 : vector<16x32xf32>
    %18 = vector.shape_cast %17 : vector<16x32xf32> to vector<2x8x32xf32>
    %cst_13 = arith.constant dense<0.000000e+00> : vector<16x32xf32>
    %19 = tpu.matmul %3, %6, %cst_13 {dimension_numbers = #tpu.dot_dimension_numbers<[1], [0], [0], [1], [0, 0, 1, 1], [], []>} : vector<16x32xf32>, vector<32x32xf32>, vector<16x32xf32> -> vector<16x32xf32>
    %20 = vector.broadcast %10 : vector<1x32xf32> to vector<16x32xf32>
    %21 = arith.addf %19, %20 : vector<16x32xf32>
    %22 = vector.shape_cast %21 : vector<16x32xf32> to vector<2x8x32xf32>
    %23 = vector.shape_cast %14 : vector<2x32xf32> to vector<2x1x32xf32>
    %24 = vector.broadcast %23 : vector<2x1x32xf32> to vector<2x8x32xf32>
    %25 = arith.mulf %24, %18 : vector<2x8x32xf32>
    %26 = vector.shape_cast %25 : vector<2x8x32xf32> to vector<16x32xf32>
    %c0_14 = arith.constant 0 : index
    %c0_15 = arith.constant 0 : index
    %27 = vector.load %arg4[%c0_14, %c0_15] : memref<32x4xf32, #tpu.memory_space<vmem>>, vector<32x4xf32>
    %cst_16 = arith.constant dense<0.000000e+00> : vector<16x4xf32>
    %28 = tpu.matmul %26, %27, %cst_16 {dimension_numbers = #tpu.dot_dimension_numbers<[1], [0], [0], [1], [0, 0, 1, 1], [], []>} : vector<16x32xf32>, vector<32x4xf32>, vector<16x4xf32> -> vector<16x4xf32>
    %29 = vector.shape_cast %28 : vector<16x4xf32> to vector<2x8x4xf32>
    %cst_17 = arith.constant dense<0xFF800000> : vector<2x4xf32>
    %30 = vector.multi_reduction <maximumf>, %29, %cst_17 [1] : vector<2x8x4xf32> to vector<2x4xf32>
    %31 = vector.shape_cast %30 : vector<2x4xf32> to vector<2x1x4xf32>
    %32 = vector.broadcast %31 : vector<2x1x4xf32> to vector<2x8x4xf32>
    %33 = arith.subf %29, %32 : vector<2x8x4xf32>
    %34 = math.exp %33 : vector<2x8x4xf32>
    %cst_18 = arith.constant dense<0.000000e+00> : vector<2x4xf32>
    %35 = vector.multi_reduction <add>, %34, %cst_18 [1] : vector<2x8x4xf32> to vector<2x4xf32>
    %36 = vector.shape_cast %35 : vector<2x4xf32> to vector<2x1x4xf32>
    %37 = vector.broadcast %36 : vector<2x1x4xf32> to vector<2x8x4xf32>
    %38 = arith.divf %34, %37 : vector<2x8x4xf32>
    %39 = vector.shape_cast %38 : vector<2x8x4xf32> to vector<16x4xf32>
    %c0_19 = arith.constant 0 : index
    %c0_20 = arith.constant 0 : index
    %40 = vector.load %arg5[%c0_19, %c0_20] : memref<4x32xf32, #tpu.memory_space<vmem>>, vector<4x32xf32>
    %cst_21 = arith.constant dense<0.000000e+00> : vector<16x32xf32>
    %41 = tpu.matmul %39, %40, %cst_21 {dimension_numbers = #tpu.dot_dimension_numbers<[1], [0], [0], [1], [0, 0, 1, 1], [], []>} : vector<16x4xf32>, vector<4x32xf32>, vector<16x32xf32> -> vector<16x32xf32>
    %42 = vector.shape_cast %41 : vector<16x32xf32> to vector<2x8x32xf32>
    %43 = arith.mulf %42, %22 : vector<2x8x32xf32>
    %cst_22 = arith.constant dense<0.000000e+00> : vector<2x32xf32>
    %44 = vector.multi_reduction <add>, %43, %cst_22 [1] : vector<2x8x32xf32> to vector<2x32xf32>
    %cst_23 = arith.constant dense<0.000000e+00> : vector<2x32xf32>
    %45 = tpu.matmul %44, %7, %cst_23 {dimension_numbers = #tpu.dot_dimension_numbers<[1], [0], [0], [1], [0, 0, 1, 1], [], []>} : vector<2x32xf32>, vector<32x32xf32>, vector<2x32xf32> -> vector<2x32xf32>
    %46 = vector.broadcast %11 : vector<1x32xf32> to vector<2x32xf32>
    %47 = arith.addf %45, %46 : vector<2x32xf32>
    %c0_24 = arith.constant 0 : index
    %c0_25 = arith.constant 0 : index
    %48 = vector.load %arg6[%c0_24, %c0_25] : memref<2x32xf32, #tpu.memory_space<vmem>>, vector<2x32xf32>
    tpu.vector_store %arg6[%c0_24, %c0_25], %47 {strides = array<i32>} : memref<2x32xf32, #tpu.memory_space<vmem>>, vector<2x32xf32>,
    return
  }
  func.func @transform_0(%arg0: i32) -> (i32, i32, i32) {
    %c0_i32 = arith.constant 0 : i32
    %c0_i32_0 = arith.constant 0 : i32
    %c0_i32_1 = arith.constant 0 : i32
    return %arg0, %c0_i32, %c0_i32_0 : i32, i32, i32
  }
  func.func @transform_1(%arg0: i32) -> (i32, i32) {
    %c0_i32 = arith.constant 0 : i32
    %c0_i32_0 = arith.constant 0 : i32
    %c0_i32_1 = arith.constant 0 : i32
    return %c0_i32, %c0_i32_0 : i32, i32
  }
  func.func @transform_2(%arg0: i32) -> (i32, i32) {
    %c0_i32 = arith.constant 0 : i32
    %c0_i32_0 = arith.constant 0 : i32
    %c0_i32_1 = arith.constant 0 : i32
    return %c0_i32, %c0_i32_0 : i32, i32
  }
  func.func @transform_3(%arg0: i32) -> (i32, i32) {
    %c0_i32 = arith.constant 0 : i32
    %c0_i32_0 = arith.constant 0 : i32
    %c0_i32_1 = arith.constant 0 : i32
    return %c0_i32, %c0_i32_0 : i32, i32
  }
  func.func @transform_4(%arg0: i32) -> (i32, i32) {
    %c0_i32 = arith.constant 0 : i32
    %c0_i32_0 = arith.constant 0 : i32
    %c0_i32_1 = arith.constant 0 : i32
    return %c0_i32, %c0_i32_0 : i32, i32
  }
  func.func @transform_5(%arg0: i32) -> (i32, i32) {
    %c0_i32 = arith.constant 0 : i32
    %c0_i32_0 = arith.constant 0 : i32
    return %arg0, %c0_i32 : i32, i32
  }
}

</mosaic_0001>

<bundles_post_ra>
// kernel: tpu_custom_call.1
= control target key start
LH: loop header
LB: loop body
LE: loop exit
PB: predicated region body
PF: predicated region fallthrough
CT: control target
= control target key end

     0   :  { %v822_v3 = vmov 0.0|0.0   ;;  %vm823_vm0 = vmmov 0   ;;  %v824_v8 = vmov 0.0   ;;  %vm52_vm1 = vcmask 261120   ;;  %s979_s0 = inlined_call_operand.vmem [shape: f32[2,8,32], index: 0, kind: input, shape index: {}]   ;;  %s980_s1 = inlined_call_operand.vmem [shape: f32[128,32], index: 1, kind: input, shape index: {}]   ;;  %s981_s2 = inlined_call_operand.vmem [shape: f32[4,32], index: 2, kind: input, shape index: {}]   ;;  %s982_s3 = inlined_call_operand.vmem [shape: f32[32,4], index: 3, kind: input, shape index: {}]   ;;  %s983_s4 = inlined_call_operand.vmem [shape: f32[4,32], index: 4, kind: input, shape index: {}]   ;;  %s984_s5 = inlined_call_operand.hbm [shape: f32[2,32], index: 5, kind: output, shape index: {}]  }
   0x1   :  { %v23_v0 = vld [vmem:[%s980_s1] sm:$0xff]  ;;  %v24_v1 = vld [vmem:[%s980_s1 + $0x8] sm:$0xff]  ;;  %v25_v2 = vld [vmem:[%s980_s1 + $0x10] sm:$0xff]  ;;  %749 = vmatprep.subr.bf16.mxu0 %v822_v3  ;;  %697 = vmatprep.mubr.msk.f32.mxu0 %vm823_vm0, %v824_v8 }
   0x2   :  { %v750_v4 = vpack.c.bf16 %v24_v1, %v23_v0  ;;  %v26_v5 = vld [vmem:[%s980_s1 + $0x18] sm:$0xff]  ;;  %v27_v6 = vld [vmem:[%s980_s1 + $0x20] sm:$0xff]  ;;  %v28_v7 = vld [vmem:[%s980_s1 + $0x28] sm:$0xff] }
   0x3   :  { %v755_v9 = vpack.c.bf16 %v28_v7, %v27_v6  ;;  %v21_v10 = vld [vmem:[%s979_s0] sm:$0xff]  ;;  %v883_v11 = vld [vmem:[%s979_s0 + $0x8] sm:$0xff]  ;;  %v29_v12 = vld [vmem:[%s980_s1 + $0x30] sm:$0xff]  ;;  %v753_v13 = vpack.c.bf16 %v26_v5, %v25_v2 }
   0x4   :  { %751 = vmatpush3.bf16.msra.mxu0 %v750_v4  ;;  %v49_v14 = vrot.slane %v883_v11, 7  ;;  %v30_v15 = vld [vmem:[%s980_s1 + $0x38] sm:$0xff]  ;;  %708 = vmatprep.mubr.msk.f32.mxu1 %vm52_vm1, %v21_v10 }
   0x5   :  { %10 = vsyncpa [#allocation3], 0  ;;  %752 = vmatprep.subr.bf16.mxu0 %v822_v3  ;;  %756 = vmatprep.subr.bf16.mxu1 %v755_v9  ;;  %vm50_vm2 = vcmask 1041409   ;;  %v759_v16 = vpack.c.bf16 %v30_v15, %v29_v12  ;;  %v322_v18 = vld [vmem:[%s982_s3] sm:$0xff]  ;;  %v323_v19 = vld [vmem:[%s982_s3 + $0x8] sm:$0xff]  ;;  %v291_v26 = vlaneseq  ;;  %vm453_vm3 = vcmask 1043456  }
   0x6   :  { %758 = vmatpush3.bf16.msra.mxu1 %v755_v9  ;;  %v51_v17 = vsel %vm50_vm2, %v49_v14, %v21_v10  ;;  %v771_v20 = vpack.c.bf16 %v323_v19, %v322_v18  ;;  %v324_v21 = vld [vmem:[%s982_s3 + $0x10] sm:$0xff]  ;;  %v325_v22 = vld [vmem:[%s982_s3 + $0x18] sm:$0xff]  ;;  %v825_v24 = vmov 1966171168   ;;  %v643_v29 = vld [vmem:[%s981_s2] ss:$0 sm:$0xff] }
   0x7   :  { %760 = vmatprep.subr.bf16.mxu1 %v759_v16  ;;  %v775_v23 = vpack.c.bf16 %v325_v22, %v324_v21  ;;  %v289_v25 = vunpack.c.l.s4 %v825_v24  ;;  %v292_v28 = vshrl.u32 %v291_v26, 7  ;;  %v645_v35 = vld [vmem:[%s981_s2 + $0x1] ss:$0 sm:$0xff]  ;;  %v32_v49 = vld [vmem:[%s980_s1 + $0x48] sm:$0xff]  ;;  %v33_v51 = vld [vmem:[%s980_s1 + $0x50] sm:$0xff]  ;;  %vm407_vm4 = vcmask 31744  }
   0x8   :  { %754 = vmatpush3.bf16.msra.mxu0 %v753_v13  ;;  %v31_v48 = vld [vmem:[%s980_s1 + $0x40] sm:$0xff]  ;;  %v34_v52 = vld [vmem:[%s980_s1 + $0x58] sm:$0xff]  ;;  %s826_s17 = smov [#allocation2]   ;;  %vm627_vm5 = vcmask 254976  }
   0x9   :  { %v290_v27 = vunpack.c.0.s8 %v289_v25  ;;  %v312_v37 = vsub.s32 0, %v292_v28  ;;  %v763_v50 = vpack.c.bf16 %v32_v49, %v31_v48  ;;  %v767_v53 = vpack.c.bf16 %v34_v52, %v33_v51  ;;  %v446_v54 = vld [vmem:[%s983_s4] sm:$0xf]  ;;  %s635_s18 = sshll.u32 %s826_s17, 4  ;;  %s636_s18 = int_to_ptr.vmem [resolvable:$true] %s635_s18 }
   0xa   :  { %762 = vmatpush3.bf16.msra.mxu1 %v759_v16  ;;  %s798_s19 = scalar_lea.vmem %s636_s18, 32  ;;  %p803_p1 = scmp.lt.s32.totalorder %s636_s18, %s636_s18 }
   0xb   :  { %698 = vmatmul.mubr.msk.f32.vlgmr.msra.gmra.mrb[0].mxu0 %vm52_vm1, %v51_v17  ;;  %772 = vmatprep.subr.bf16.mxu1 %v771_v20  ;;  %v293_v30 = vsub.s32 %v290_v27, %v292_v28  ;;  %p799_p0 = scmp.ne.s32.totalorder %s636_s18, %s798_s19  ;;  %p804_p2 = scmp.lt.s32.totalorder %s798_s19, %s798_s19 }
   0xc   :  { %719 = vmatprep.mubr.msk.f32.mxu0 %vm52_vm1, %v21_v10  ;;  %764 = vmatprep.subr.bf16.mxu0 %v763_v50 }
   0xd   :  { %709 = vmatmul.mubr.msk.f32.vlgmr.msra.gmra.mrb[0].mxu1 %vm52_vm1, %v883_v11  ;;  %766 = vmatpush3.bf16.msra.mxu0 %v763_v50  ;;  %p805_p3 = por %p804_p2, %p803_p1 }
   0xe   :  { %774 = vmatpush3.bf16.msra.mxu1 %v771_v20  ;;  %768 = vmatprep.subr.bf16.mxu0 %v767_v53 }
   0xf   :  { %776 = vmatprep.subr.bf16.mxu1 %v775_v23  ;;  %p806_p4 = pnand %p805_p3, %p799_p0 }
  0x11   :  { %770 = vmatpush3.bf16.msra.mxu0 %v767_v53 }
  0x12   :  { %778 = vmatpush3.bf16.msra.mxu1 %v775_v23  ;;  %733 = vmatprep.subr.msk.mxu0 %vm453_vm3, %v446_v54 }
  0x13   :  { %779 = vmatprep.subr.bf16.mxu1 %v822_v3 }
  0x14   :  { %720 = vmatmul.mubr.msk.f32.vlgmr.msra.gmra.mrb[2].mxu0 %vm52_vm1, %v883_v11 }
  0x15   :  { %734 = vmatpush3.msk.msra.mxu0 %vm453_vm3, %v446_v54 }
  0xde   :  { %v121_v31 = vpop.f32.mrb[0].mxu0 }
  0xdf   :  { %v122_v32 = vadd.f32 %v643_v29, %v121_v31  ;;  %v699_v33 = vpop.f32.mrb[1].mxu0 }
  0xe0   :  { %v710_v34 = vpop.f32.mrb[0].mxu1 }
  0xe1   :  { %v294_v36 = vrot.slane %v122_v32, %v293_v30  ;;  %v199_v38 = vpop.f32.mrb[1].mxu1  ;;  %v205_v44 = vadd.f32 %v710_v34, %v645_v35  ;;  %v35_v34 = vld [vmem:[%s980_s1 + $0x60] sm:$0xff] }
  0xe2   :  { %v200_v41 = vadd.f32 %v645_v35, %v199_v38  ;;  %v36_v35 = vld [vmem:[%s980_s1 + $0x68] sm:$0xff]  ;;  %v38_v38 = vld [vmem:[%s980_s1 + $0x78] sm:$0xff] }
  0xe3   :  { %v295_v39 = vcombine.high %v294_v36, %v294_v36  ;;  %v302_v40 = vrot.slane %v294_v36, %v293_v30  ;;  %v780_v36 = vpack.c.bf16 %v36_v35, %v35_v34 }
  0xe5   :  { %v309_v42 = vrot.slane %v295_v39, %v293_v30  ;;  %v313_v43 = vrot.slane %v302_v40, %v312_v37  ;;  %v648_v40 = vld [vmem:[%s981_s2 + $0x2] ss:$0 sm:$0xff] }
  0xe7   :  { %v317_v45 = vrot.slane %v309_v42, %v312_v37  ;;  %v320_v46 = vmul.f32 %v313_v43, %v200_v41  ;;  %v721_v32 = vpop.f32.mrb[2].mxu0  ;;  %v37_v37 = vld [vmem:[%s980_s1 + $0x70] sm:$0xff] }
  0xe8   :  { %v278_v33 = vpop.f32.mrb[3].mxu0  ;;  %v783_v39 = vpack.c.bf16 %v38_v38, %v37_v37  ;;  %v284_v41 = vadd.f32 %v721_v32, %v648_v40 }
  0xe9   :  { %v321_v47 = vmul.f32 %v317_v45, %v205_v44  ;;  %730 = vmatprep.mubr.msk.f32.mxu1 %vm52_vm1, %v320_v46  ;;  %v279_v42 = vadd.f32 %v648_v40, %v278_v33 }
  0xeb   :  { %731 = vmatmul.mubr.msk.f32.vlgmr.msra.gmra.mrb[2].mxu1 %vm52_vm1, %v321_v47 }
  0xec   :  { %746 = vmatprep.mubr.msk.f32.mxu1 %vm823_vm0, %v824_v8  ;;  %781 = vmatpush3.bf16.msra.mxu1 %v780_v36 }
  0xed   :  { %782 = vmatprep.subr.bf16.mxu1 %v822_v3 }
  0xf0   :  { %784 = vmatpush3.bf16.msra.mxu1 %v783_v39 }
 0x1be   :  { %v732_v55 = vpop.f32.mrb[2].mxu1 }
 0x1bf   :  { %v415_v56 = vsel %vm407_vm4, %v732_v55, -inf  ;;  %v398_v57 = vpop.f32.mrb[3].mxu1 }
 0x1c0   :  { %v416_v58 = vrot.slane %v415_v56, 4  ;;  %v408_v59 = vsel %vm407_vm4, %v398_v57, -inf }
 0x1c1   :  { %v409_v60 = vrot.slane %v408_v59, 4 }
 0x1c2   :  { %v417_v61 = vmax.f32 %v415_v56, %v416_v58 }
 0x1c3   :  { %v410_v62 = vmax.f32 %v408_v59, %v409_v60 }
 0x1c4   :  { %v418_v63 = vrot.slane %v417_v61, 2 }
 0x1c5   :  { %v411_v0 = vrot.slane %v410_v62, 2 }
 0x1c6   :  { %v419_v1 = vmax.f32 %v417_v61, %v418_v63  ;;  %v656_v61 = vld [vmem:[%s981_s2 + $0x3] ss:$0 sm:$0xff] }
 0x1c7   :  { %v412_v2 = vmax.f32 %v410_v62, %v411_v0 }
 0x1c8   :  { %v420_v4 = vrot.slane %v419_v1, 1 }
 0x1c9   :  { %v413_v5 = vrot.slane %v412_v2, 1 }
 0x1ca   :  { %v421_v6 = vmax.f32 %v419_v1, %v420_v4 }
 0x1cb   :  { %v414_v7 = vmax.f32 %v412_v2, %v413_v5 }
 0x1cc   :  { %v423_v8 = vsub.f32 %v732_v55, %v421_v6 }
 0x1cd   :  { %v422_v9 = vsub.f32 %v398_v57, %v414_v7 }
 0x1ce   :  { %v426_v10 = vmul.f32 1.442695, %v423_v8 }
 0x1cf   :  { %v424_v11 = vmul.f32 1.442695, %v422_v9 }
 0x1d0   :  { %790 = vpow2.f32 %v426_v10 }
 0x1d1   :  { %792 = vpow2.f32 %v424_v11 }
 0x1da   :  { %v791_v12 = vpop.eup %790 }
 0x1db   :  { %v793_v13 = vpop.eup %792  ;;  %v435_v14 = vsel %vm407_vm4, %v791_v12, 0.0 }
 0x1dc   :  { %v436_v15 = vrot.slane %v435_v14, 4  ;;  %v428_v16 = vsel %vm407_vm4, %v793_v13, 0.0 }
 0x1dd   :  { %v429_v17 = vrot.slane %v428_v16, 4 }
 0x1de   :  { %v437_v18 = vadd.f32 %v436_v15, %v435_v14 }
 0x1df   :  { %v430_v19 = vadd.f32 %v429_v17, %v428_v16 }
 0x1e0   :  { %v438_v20 = vrot.slane %v437_v18, 2 }
 0x1e1   :  { %v431_v21 = vrot.slane %v430_v19, 2 }
 0x1e2   :  { %v439_v22 = vadd.f32 %v438_v20, %v437_v18 }
 0x1e3   :  { %v432_v23 = vadd.f32 %v431_v21, %v430_v19 }
 0x1e4   :  { %v440_v24 = vrot.slane %v439_v22, 1 }
 0x1e5   :  { %v433_v25 = vrot.slane %v432_v23, 1 }
 0x1e6   :  { %v441_v26 = vadd.f32 %v440_v24, %v439_v22 }
 0x1e7   :  { %v434_v27 = vadd.f32 %v433_v25, %v432_v23 }
 0x1e8   :  { %794 = vrcp.f32 %v441_v26 }
 0x1e9   :  { %796 = vrcp.f32 %v434_v27 }
 0x1f2   :  { %v795_v28 = vpop.eup %794 }
 0x1f3   :  { %v797_v29 = vpop.eup %796  ;;  %v445_v31 = vmul.f32 %v795_v28, %v791_v12 }
 0x1f4   :  { %v443_v30 = vmul.f32 %v797_v29, %v793_v13 }
 0x1f6   :  { %735 = vmatprep.mubr.msk.f32.mxu0 %vm407_vm4, %v443_v30 }
 0x1f7   :  { %736 = vmatmul.mubr.msk.f32.vlgmr.msra.gmra.mrb[4].mxu0 %vm407_vm4, %v445_v31 }
 0x2ca   :  { %v737_v43 = vpop.f32.mrb[4].mxu0 }
 0x2cb   :  { %v533_v44 = vmul.f32 %v737_v43, %v284_v41  ;;  %v523_v45 = vpop.f32.mrb[5].mxu0 }
 0x2cc   :  { %v532_v3 = vmul.f32 %v523_v45, %v279_v42 }
 0x2cd   :  { %v541_v46 = vsel %vm52_vm1, %v533_v44, 0.0 }
 0x2ce   :  { %v542_v47 = vrot.slane %v541_v46, 4  ;;  %v534_v48 = vsel %vm52_vm1, %v532_v3, 0.0 }
 0x2cf   :  { %v535_v49 = vrot.slane %v534_v48, 4 }
 0x2d0   :  { %v543_v50 = vadd.f32 %v542_v47, %v541_v46 }
 0x2d1   :  { %v536_v51 = vadd.f32 %v535_v49, %v534_v48 }
 0x2d2   :  { %v544_v52 = vrot.slane %v543_v50, 2 }
 0x2d3   :  { %v537_v53 = vrot.slane %v536_v51, 2 }
 0x2d4   :  { %v545_v54 = vadd.f32 %v544_v52, %v543_v50 }
 0x2d5   :  { %v538_v55 = vadd.f32 %v537_v53, %v536_v51 }
 0x2d6   :  { %v546_v56 = vrot.slane %v545_v54, 1 }
 0x2d7   :  { %v539_v57 = vrot.slane %v538_v55, 1 }
 0x2d8   :  { %v547_v58 = vadd.f32 %v546_v56, %v545_v54 }
 0x2d9   :  { %v540_v59 = vadd.f32 %v539_v57, %v538_v55 }
 0x2db   :  { %v554_v60 = vsel %vm50_vm2, %v547_v58, %v540_v59 }
 0x2dc   :  { %747 = vmatmul.mubr.msk.f32.vlgmr.msra.gmra.mrb[4].mxu1 %vm52_vm1, %v554_v60 }
 0x3af   :  { %v623_v62 = vpop.f32.mrb[4].mxu1 }
 0x3b0   :  { %v624_v63 = vadd.f32 %v656_v61, %v623_v62  ;;  %v748_v0 = vpop.f32.mrb[5].mxu1 }
 0x3b2   :  { %628 = vst.msk [vmem:[#allocation2] sm:$0x3] %vm627_vm5, %v624_v63 }
 0x3b3   :  { %809 = shalt.err (!%p806_p4)
}
 0x3b4   :  { %s810_s3 = scalar_lea.hbm %s984_s5, 32 }
 0x3b5   :  { %p811_p5 = scmp.ne.s32.totalorder %s984_s5, %s810_s3  ;;  %p814_p6 = scmp.lt.u32.totalorder %s810_s3, %s984_s5 }
 0x3b7   :  { %p816_p7 = pnand %p814_p6, %p811_p5 }
 0x3b9   :  { %819 = shalt.err (!%p816_p7)
}
 0x3ba   :  { %638 = dma.vmem_to_hbm [thread:$0]  %s636_s18, 32, %s984_s5, [#allocation3]  }
 0x3bb   :  { %820 = dma.done.wait [#allocation3], 32  }
 0x3bc   :  { %821 = vsyncadd [#allocation3], 4294967264 }
 0x3bd   :  { %642 = vsyncpa [#allocation3], 1 }

</bundles_post_ra>
